<compile_context>
chip_gen: v7x
topology: tpu7x:2x2x1
jax: 0.10.0
libtpu: 0.0.40
codegen_flags: <defaults>
</compile_context>

<pallas_src>
import jax
import jax.numpy as jnp
from jax.experimental import pallas as pl
from jax.experimental.pallas import tpu as pltpu


def _round_up(n, m):
    return ((n + m - 1) // m) * m


def simple_nn_kernel(x_ref, w1_ref, b1_ref, w2_ref, b2_ref, w3_ref, b3_ref, o_ref):
    """One batch tile.

    x_ref:  [TB, input_dim]   (natural layout; batch moves to lanes inside the kernel)
    w*_ref: [out, in]          b*_ref: [out, 1]
    o_ref:  [1, TB]            (lane-dense output stores)
    """
    x = x_ref[...]  # f32

    # fc1 + ReLU  (input_dim -> 16):  h1 = W1 @ x.T  -> [16, TB]
    h1 = jnp.dot(w1_ref[...], x.T, preferred_element_type=jnp.float32) + b1_ref[...]
    h1 = jnp.maximum(h1, 0.0)
    # dropout1: identity in eval mode

    # fc2 + ReLU  (16 -> 8) -> [8, TB]
    h2 = jnp.dot(w2_ref[...], h1, preferred_element_type=jnp.float32) + b2_ref[...]
    h2 = jnp.maximum(h2, 0.0)
    # dropout2, dropout3: identity in eval mode

    # fc4 + sigmoid (8 -> 1) -> [1, TB]
    logits = jnp.dot(w3_ref[...], h2, preferred_element_type=jnp.float32) + b3_ref[...]
    o_ref[...] = jax.nn.sigmoid(logits).astype(o_ref.dtype)


def simple_nn_forward(x, params, *, block_batch=1024):
    """x: [B, input_dim] float32. params: PyTorch-layout weights (w: [out, in], b: [out])."""
    B, input_dim = x.shape
    w1, b1 = params["w1"], params["b1"]   # [16, input_dim], [16]
    w2, b2 = params["w2"], params["b2"]   # [8, 16],         [8]
    w3, b3 = params["w3"], params["b3"]   # [1, 8],          [1]

    # Batch tile: multiple of 128 so the output stores stay lane-dense; ragged tails are
    # handled by Pallas boundary blocks (no padding pass in the wrapper).
    TB = min(_round_up(block_batch, 128), _round_up(B, 128))
    nb = pl.cdiv(B, TB)

    # Biases as columns so they broadcast along the lane (batch) axis inside the kernel.
    b1c = b1.reshape(-1, 1)   # [16, 1]
    b2c = b2.reshape(-1, 1)   # [8, 1]
    b3c = b3.reshape(-1, 1)   # [1, 1]

    # Weights / biases: full-array blocks at a constant block index -> VMEM-resident across steps.
    resident = lambda a: pl.BlockSpec(a.shape, lambda i: (0, 0))

    flops = 2 * B * (input_dim * 16 + 16 * 8 + 8 * 1)
    bytes_accessed = (
        (x.size + B) * 4
        + 4 * sum(p.size for p in (w1, b1c, w2, b2c, w3, b3c))
    )

    out = pl.pallas_call(
        simple_nn_kernel,
        out_shape=jax.ShapeDtypeStruct((1, B), jnp.float32),
        grid_spec=pltpu.PrefetchScalarGridSpec(
            num_scalar_prefetch=0,
            grid=(nb,),
            in_specs=[
                pl.BlockSpec((TB, input_dim), lambda i: (i, 0)),  # x tile (natural layout)
                resident(w1), resident(b1c),
                resident(w2), resident(b2c),
                resident(w3), resident(b3c),
            ],
            out_specs=pl.BlockSpec((1, TB), lambda i: (0, i)),    # lane-dense output store
        ),
        compiler_params=pltpu.CompilerParams(
            dimension_semantics=("parallel",),   # shard batch axis across TensorCores (v7x)
            vmem_limit_bytes=32 * 1024 * 1024,   # tiny footprint; safe on v5e/v6e/v7x
        ),
        cost_estimate=pl.CostEstimate(
            flops=flops, transcendentals=B, bytes_accessed=bytes_accessed),
    )(x, w1, b1c, w2, b2c, w3, b3c)

    # Back to the module's [B, 1] layout.
    return out.reshape(B, 1)


def init_params(input_dim, key):
    """Deterministic synthetic init; shapes match nn.Linear of SimpleNN (weight = [out, in])."""
    k1, k2, k3, k4, k5, k6 = jax.random.split(key, 6)
    return {
        "w1": jax.random.normal(k1, (16, input_dim), jnp.float32) * 0.1,
        "b1": jax.random.normal(k2, (16,), jnp.float32) * 0.1,
        "w2": jax.random.normal(k3, (8, 16), jnp.float32) * 0.1,
        "b2": jax.random.normal(k4, (8,), jnp.float32) * 0.1,
        "w3": jax.random.normal(k5, (1, 8), jnp.float32) * 0.1,
        "b3": jax.random.normal(k6, (1,), jnp.float32) * 0.1,
    }


def reference_forward(x, params):
    """Pure-JAX reference (eval-mode dropout == identity)."""
    h1 = jnp.maximum(x @ params["w1"].T + params["b1"], 0.0)
    h2 = jnp.maximum(h1 @ params["w2"].T + params["b2"], 0.0)
    return jax.nn.sigmoid(h2 @ params["w3"].T + params["b3"])


if __name__ == "__main__":
    key = jax.random.PRNGKey(0)
    kx, kp, kx2 = jax.random.split(key, 3)

    batch, input_dim = 8, 32
    x = jax.random.normal(kx, (batch, input_dim), jnp.float32)
    params = init_params(input_dim, kp)

    out = jax.block_until_ready(simple_nn_forward(x, params))
    ref = reference_forward(x, params)
    assert out.shape == (batch, 1), out.shape
    assert jnp.allclose(out, ref, atol=1e-5, rtol=1e-5), (out, ref)

    # Exercise the multi-step grid + ragged batch tail (boundary-block path) with a small tile.
    batch2 = 300
    x2 = jax.random.normal(kx2, (batch2, input_dim), jnp.float32)
    out2 = jax.block_until_ready(simple_nn_forward(x2, params, block_batch=128))
    ref2 = reference_forward(x2, params)
    assert out2.shape == (batch2, 1), out2.shape
    assert jnp.allclose(out2, ref2, atol=1e-5, rtol=1e-5), (out2, ref2)

    # TODO(synk): train-mode dropout (stochastic masking via pltpu.prng_*) is intentionally not
    # implemented; the PyTorch forward in inference mode treats all Dropout layers as identity.
    print("KERNEL_OK")
</pallas_src>

<mosaic_0001>
module attributes {stable_mosaic.version = 11 : i64} {
  func.func @simple_nn_kernel(%arg0: i32, %arg1: memref<128x32xf32, #tpu.memory_space<vmem>>, %arg2: memref<16x32xf32, #tpu.memory_space<vmem>>, %arg3: memref<16x1xf32, #tpu.memory_space<vmem>>, %arg4: memref<8x16xf32, #tpu.memory_space<vmem>>, %arg5: memref<8x1xf32, #tpu.memory_space<vmem>>, %arg6: memref<1x8xf32, #tpu.memory_space<vmem>>, %arg7: memref<1x1xf32, #tpu.memory_space<vmem>>, %arg8: memref<1x128xf32, #tpu.memory_space<vmem>>) attributes {dimension_semantics = [#tpu.dimension_semantics<parallel>], iteration_bounds = array<i64: 1>, scalar_prefetch = 0 : i64, scratch_operands = 0 : i64, tpu.core_type = #tpu.core_type<tc>, window_params = [{transform_indices = @transform_0, window_bounds = array<i64: 128, 32>}, {pipeline_mode = #tpu.pipeline_mode<synchronous>, transform_indices = @transform_1, window_bounds = array<i64: 16, 32>}, {pipeline_mode = #tpu.pipeline_mode<synchronous>, transform_indices = @transform_2, window_bounds = array<i64: 16, 1>}, {pipeline_mode = #tpu.pipeline_mode<synchronous>, transform_indices = @transform_3, window_bounds = array<i64: 8, 16>}, {pipeline_mode = #tpu.pipeline_mode<synchronous>, transform_indices = @transform_4, window_bounds = array<i64: 8, 1>}, {pipeline_mode = #tpu.pipeline_mode<synchronous>, transform_indices = @transform_5, window_bounds = array<i64: 1, 8>}, {pipeline_mode = #tpu.pipeline_mode<synchronous>, transform_indices = @transform_6, window_bounds = array<i64: 1, 1>}, {transform_indices = @transform_7, window_bounds = array<i64: 1, 128>}]} {
    %c0 = arith.constant 0 : index
    %c0_0 = arith.constant 0 : index
    %0 = vector.load %arg1[%c0, %c0_0] : memref<128x32xf32, #tpu.memory_space<vmem>>, vector<128x32xf32>
    %c0_1 = arith.constant 0 : index
    %c0_2 = arith.constant 0 : index
    %1 = vector.load %arg2[%c0_1, %c0_2] : memref<16x32xf32, #tpu.memory_space<vmem>>, vector<16x32xf32>
    %2 = tpu.transpose %0, [1, 0] : vector<128x32xf32> -> vector<32x128xf32>
    %cst = arith.constant dense<0.000000e+00> : vector<16x128xf32>
    %3 = tpu.matmul %1, %2, %cst {dimension_numbers = #tpu.dot_dimension_numbers<[1], [0], [0], [1], [0, 0, 1, 1], [], []>} : vector<16x32xf32>, vector<32x128xf32>, vector<16x128xf32> -> vector<16x128xf32>
    %c0_3 = arith.constant 0 : index
    %c0_4 = arith.constant 0 : index
    %4 = vector.load %arg3[%c0_3, %c0_4] : memref<16x1xf32, #tpu.memory_space<vmem>>, vector<16x1xf32>
    %5 = vector.broadcast %4 : vector<16x1xf32> to vector<16x128xf32>
    %6 = arith.addf %3, %5 : vector<16x128xf32>
    %cst_5 = arith.constant 0.000000e+00 : f32
    %7 = vector.broadcast %cst_5 : f32 to vector<16x128xf32>
    %8 = arith.maximumf %6, %7 : vector<16x128xf32>
    %c0_6 = arith.constant 0 : index
    %c0_7 = arith.constant 0 : index
    %9 = vector.load %arg4[%c0_6, %c0_7] : memref<8x16xf32, #tpu.memory_space<vmem>>, vector<8x16xf32>
    %cst_8 = arith.constant dense<0.000000e+00> : vector<8x128xf32>
    %10 = tpu.matmul %9, %8, %cst_8 {dimension_numbers = #tpu.dot_dimension_numbers<[1], [0], [0], [1], [0, 0, 1, 1], [], []>} : vector<8x16xf32>, vector<16x128xf32>, vector<8x128xf32> -> vector<8x128xf32>
    %c0_9 = arith.constant 0 : index
    %c0_10 = arith.constant 0 : index
    %11 = vector.load %arg5[%c0_9, %c0_10] : memref<8x1xf32, #tpu.memory_space<vmem>>, vector<8x1xf32>
    %12 = vector.broadcast %11 : vector<8x1xf32> to vector<8x128xf32>
    %13 = arith.addf %10, %12 : vector<8x128xf32>
    %cst_11 = arith.constant 0.000000e+00 : f32
    %14 = vector.broadcast %cst_11 : f32 to vector<8x128xf32>
    %15 = arith.maximumf %13, %14 : vector<8x128xf32>
    %c0_12 = arith.constant 0 : index
    %c0_13 = arith.constant 0 : index
    %16 = vector.load %arg6[%c0_12, %c0_13] : memref<1x8xf32, #tpu.memory_space<vmem>>, vector<1x8xf32>
    %cst_14 = arith.constant dense<0.000000e+00> : vector<1x128xf32>
    %17 = tpu.matmul %16, %15, %cst_14 {dimension_numbers = #tpu.dot_dimension_numbers<[1], [0], [0], [1], [0, 0, 1, 1], [], []>} : vector<1x8xf32>, vector<8x128xf32>, vector<1x128xf32> -> vector<1x128xf32>
    %c0_15 = arith.constant 0 : index
    %c0_16 = arith.constant 0 : index
    %18 = vector.load %arg7[%c0_15, %c0_16] : memref<1x1xf32, #tpu.memory_space<vmem>>, vector<1x1xf32>
    %19 = vector.broadcast %18 : vector<1x1xf32> to vector<1x128xf32>
    %20 = arith.addf %17, %19 : vector<1x128xf32>
    %21 = arith.negf %20 : vector<1x128xf32>
    %22 = math.exp %21 : vector<1x128xf32>
    %cst_17 = arith.constant 1.000000e+00 : f32
    %23 = vector.broadcast %cst_17 : f32 to vector<1x128xf32>
    %24 = arith.addf %23, %22 : vector<1x128xf32>
    %25 = arith.divf %23, %24 : vector<1x128xf32>
    %c0_18 = arith.constant 0 : index
    %c0_19 = arith.constant 0 : index
    %26 = vector.load %arg8[%c0_18, %c0_19] : memref<1x128xf32, #tpu.memory_space<vmem>>, vector<1x128xf32>
    tpu.vector_store %arg8[%c0_18, %c0_19], %25 {strides = array<i32>} : memref<1x128xf32, #tpu.memory_space<vmem>>, vector<1x128xf32>,
    return
  }
  func.func @transform_0(%arg0: i32) -> (i32, i32) {
    %c0_i32 = arith.constant 0 : i32
    %c0_i32_0 = arith.constant 0 : i32
    return %arg0, %c0_i32 : i32, i32
  }
  func.func @transform_1(%arg0: i32) -> (i32, i32) {
    %c0_i32 = arith.constant 0 : i32
    %c0_i32_0 = arith.constant 0 : i32
    %c0_i32_1 = arith.constant 0 : i32
    return %c0_i32, %c0_i32_0 : i32, i32
  }
  func.func @transform_2(%arg0: i32) -> (i32, i32) {
    %c0_i32 = arith.constant 0 : i32
    %c0_i32_0 = arith.constant 0 : i32
    %c0_i32_1 = arith.constant 0 : i32
    return %c0_i32, %c0_i32_0 : i32, i32
  }
  func.func @transform_3(%arg0: i32) -> (i32, i32) {
    %c0_i32 = arith.constant 0 : i32
    %c0_i32_0 = arith.constant 0 : i32
    %c0_i32_1 = arith.constant 0 : i32
    return %c0_i32, %c0_i32_0 : i32, i32
  }
  func.func @transform_4(%arg0: i32) -> (i32, i32) {
    %c0_i32 = arith.constant 0 : i32
    %c0_i32_0 = arith.constant 0 : i32
    %c0_i32_1 = arith.constant 0 : i32
    return %c0_i32, %c0_i32_0 : i32, i32
  }
  func.func @transform_5(%arg0: i32) -> (i32, i32) {
    %c0_i32 = arith.constant 0 : i32
    %c0_i32_0 = arith.constant 0 : i32
    %c0_i32_1 = arith.constant 0 : i32
    return %c0_i32, %c0_i32_0 : i32, i32
  }
  func.func @transform_6(%arg0: i32) -> (i32, i32) {
    %c0_i32 = arith.constant 0 : i32
    %c0_i32_0 = arith.constant 0 : i32
    %c0_i32_1 = arith.constant 0 : i32
    return %c0_i32, %c0_i32_0 : i32, i32
  }
  func.func @transform_7(%arg0: i32) -> (i32, i32) {
    %c0_i32 = arith.constant 0 : i32
    %c0_i32_0 = arith.constant 0 : i32
    return %c0_i32, %arg0 : i32, i32
  }
}

</mosaic_0001>

<bundles_post_ra>
// kernel: tpu_custom_call.1
= control target key start
LH: loop header
LB: loop body
LE: loop exit
PB: predicated region body
PF: predicated region fallthrough
CT: control target
= control target key end

     0   :  { %s727_s0 = inlined_call_operand.vmem [shape: f32[8,32], index: 0, kind: input, shape index: {}]   ;;  %s728_s1 = inlined_call_operand.vmem [shape: f32[16,32], index: 1, kind: input, shape index: {}]   ;;  %s729_s2 = inlined_call_operand.vmem [shape: f32[16,1], index: 2, kind: input, shape index: {}]   ;;  %s730_s3 = inlined_call_operand.vmem [shape: f32[8,16], index: 3, kind: input, shape index: {}]   ;;  %s731_s4 = inlined_call_operand.vmem [shape: f32[8,1], index: 4, kind: input, shape index: {}]   ;;  %s732_s5 = inlined_call_operand.vmem [shape: f32[1,8], index: 5, kind: input, shape index: {}]   ;;  %s733_s6 = inlined_call_operand.<no memory space> [shape: f32[1,1], index: 6, kind: input, shape index: {}]   ;;  %s734_s7 = inlined_call_operand.hbm [shape: f32[1,8], index: 7, kind: output, shape index: {}]  }
   0x1   :  { %v12_v0 = vstv %s733_s6 }
   0x2   :  { %13 = vst [vmem:[#allocation2] sm:$0x1] %v12_v0 }
   0x3   :  { %v29_v1 = vld [vmem:[%s727_s0] sm:$0xff]  ;;  %v30_v2 = vld [vmem:[%s727_s0 + $0x8] sm:$0xff]  ;;  %vm59_vm0 = vcmask 261120   ;;  %v31_v3 = vld [vmem:[%s727_s0 + $0x10] sm:$0xff]  ;;  %v556_v7 = vmov 0  }
   0x4   :  { %v470_v4 = vpack.c.bf16 %v30_v2, %v29_v1  ;;  %vm615_vm1 = vmpackc.low %vm59_vm0, %vm59_vm0  ;;  %v32_v6 = vld [vmem:[%s727_s0 + $0x18] sm:$0xff]  ;;  %526 = vset.pattern.permute.xlu0 %v556_v7  ;;  %527 = vset.pattern.permute.xlu1 %v556_v7  ;;  %v45_v9 = vld [vmem:[%s728_s1] sm:$0xff] }
   0x5   :  { %v476_v8 = vpack.c.bf16 %v32_v6, %v31_v3  ;;  %v33_v10 = vld [vmem:[%s727_s0 + $0x20] sm:$0xff]  ;;  %v34_v11 = vld [vmem:[%s727_s0 + $0x28] sm:$0xff]  ;;  %455 = vmatprep.mubr.msk.f32.mxu0 %vm59_vm0, %v45_v9 }
   0x6   :  { %472 = vmatprep.subr.msk.bf16.mxu0 %vm615_vm1, %v470_v4  ;;  %v47_v12 = vld [vmem:[%s729_s2] sm:$0xff] }
   0x7   :  { %475 = vmatpush3.bf16.xpose.msk.msra.mxu0 %vm615_vm1, %v470_v4  ;;  %51 = vperm.xlu0 %526, %v47_v12  }
   0x8   :  { %478 = vmatprep.subr.msk.bf16.mxu0 %vm615_vm1, %v476_v8 }
   0x9   :  { %14 = vsyncpa [#allocation4], 0  ;;  %v48_v13 = vld [vmem:[%s729_s2 + $0x8] sm:$0xff]  ;;  %v482_v14 = vpack.c.bf16 %v34_v11, %v33_v10  ;;  %v35_v15 = vld [vmem:[%s727_s0 + $0x30] sm:$0xff]  ;;  %v557_v31 = vmov 0.0|0.0   ;;  %vm558_vm2 = vmmov 0   ;;  %v280_v51 = vlaneseq }
   0xa   :  { %v36_v16 = vld [vmem:[%s727_s0 + $0x38] sm:$0xff]  ;;  %v37_v18 = vld [vmem:[%s727_s0 + $0x40] sm:$0xff]  ;;  %v38_v19 = vld [vmem:[%s727_s0 + $0x48] sm:$0xff]  ;;  %518 = vmatprep.subr.bf16.mxu1 %v557_v31  ;;  %v559_v32 = vmov 0.0   ;;  %vm198_vm3 = vcmask 130048   ;;  %vm284_vm4 = vcmask 64512  }
   0xb   :  { %56 = vperm.xlu0 %526, %v48_v13   ;;  %v488_v17 = vpack.c.bf16 %v36_v16, %v35_v15  ;;  %v494_v20 = vpack.c.bf16 %v38_v19, %v37_v18  ;;  %v39_v21 = vld [vmem:[%s727_s0 + $0x50] sm:$0xff]  ;;  %v40_v22 = vld [vmem:[%s727_s0 + $0x58] sm:$0xff]  ;;  %v41_v24 = vld [vmem:[%s727_s0 + $0x60] sm:$0xff]  ;;  %462 = vmatprep.mubr.msk.f32.mxu1 %vm558_vm2, %v559_v32  ;;  %v281_v52 = vshrl.u32 %v280_v51, 7 }
   0xc   :  { %v500_v23 = vpack.c.bf16 %v40_v22, %v39_v21  ;;  %v42_v25 = vld [vmem:[%s727_s0 + $0x68] sm:$0xff]  ;;  %v43_v27 = vld [vmem:[%s727_s0 + $0x70] sm:$0xff]  ;;  %v44_v28 = vld [vmem:[%s727_s0 + $0x78] sm:$0xff] }
   0xd   :  { %v506_v26 = vpack.c.bf16 %v42_v25, %v41_v24  ;;  %v512_v29 = vpack.c.bf16 %v44_v28, %v43_v27  ;;  %v46_v30 = vld [vmem:[%s728_s1 + $0x8] sm:$0xff]  ;;  %v192_v33 = vld [vmem:[%s731_s4] sm:$0xff]  ;;  %v282_v53 = vsub.s32 0, %v281_v52 }
   0xe   :  { %195 = vperm.xlu1 %527, %v192_v33   ;;  %v274_v34 = vld [vmem:[#allocation2] sm:$0x1] }
   0xf   :  { %481 = vmatpush3.bf16.xpose.msk.msra.mxu0 %vm615_vm1, %v476_v8  ;;  %v191_v44 = vld [vmem:[%s730_s3] sm:$0xff]  ;;  %s560_s3 = smov [#allocation3]  }
  0x10   :  { %484 = vmatprep.subr.msk.bf16.mxu0 %vm615_vm1, %v482_v14  ;;  %v273_v50 = vld [vmem:[%s732_s5] sm:$0x1]  ;;  %s371_s20 = sshll.u32 %s560_s3, 4  ;;  %s372_s20 = int_to_ptr.vmem [resolvable:$true] %s371_s20 }
  0x11   :  { %s532_s5 = scalar_lea.vmem %s372_s20, 16  ;;  %s536_s21 = scalar_lea.vmem %s372_s20, 32 }
  0x12   :  { %277 = vperm.xlu1 %527, %v274_v34   ;;  %p533_p0 = scmp.ne.s32.totalorder %s372_s20, %s532_s5  ;;  %p537_p1 = scmp.lt.s32.totalorder %s372_s20, %s372_s20 }
  0x13   :  { %p538_p2 = scmp.lt.s32.totalorder %s536_s21, %s532_s5 }
  0x15   :  { %p539_p3 = por %p538_p2, %p537_p1 }
  0x17   :  { %487 = vmatpush3.bf16.xpose.msk.msra.mxu0 %vm615_vm1, %v482_v14  ;;  %p540_p4 = pnand %p539_p3, %p533_p0 }
  0x18   :  { %490 = vmatprep.subr.msk.bf16.mxu0 %vm615_vm1, %v488_v17 }
  0x1f   :  { %493 = vmatpush3.bf16.xpose.msk.msra.mxu0 %vm615_vm1, %v488_v17 }
  0x20   :  { %496 = vmatprep.subr.msk.bf16.mxu0 %vm615_vm1, %v494_v20 }
  0x27   :  { %499 = vmatpush3.bf16.xpose.msk.msra.mxu0 %vm615_vm1, %v494_v20 }
  0x28   :  { %502 = vmatprep.subr.msk.bf16.mxu0 %vm615_vm1, %v500_v23 }
  0x2f   :  { %505 = vmatpush3.bf16.xpose.msk.msra.mxu0 %vm615_vm1, %v500_v23 }
  0x30   :  { %508 = vmatprep.subr.msk.bf16.mxu0 %vm615_vm1, %v506_v26 }
  0x37   :  { %511 = vmatpush3.bf16.xpose.msk.msra.mxu0 %vm615_vm1, %v506_v26 }
  0x38   :  { %514 = vmatprep.subr.msk.bf16.mxu0 %vm615_vm1, %v512_v29 }
  0x3f   :  { %517 = vmatpush3.bf16.xpose.msk.msra.mxu0 %vm615_vm1, %v512_v29 }
  0x46   :  { %456 = vmatmul.mubr.msk.f32.vlgmr.msra.gmra.mrb[0].mxu0 %vm59_vm0, %v46_v30 }
  0x86   :  { %v52_v35 = vpop.permute.xlu0 %51 }
  0x8a   :  { %v57_v36 = vpop.permute.xlu0 %56 }
  0x8d   :  { %v196_v45 = vpop.permute.xlu1 %195 }
  0x91   :  { %v278_v54 = vpop.permute.xlu1 %277 }
  0x92   :  { %v283_v55 = vrot.slane %v278_v54, %v282_v53 }
 0x119   :  { %v457_v37 = vpop.f32.mrb[0].mxu0 }
 0x11a   :  { %v186_v38 = vadd.f32 %v457_v37, %v57_v36  ;;  %v180_v39 = vpop.f32.mrb[1].mxu0 }
 0x11b   :  { %v181_v40 = vadd.f32 %v180_v39, %v52_v35 }
 0x11c   :  { %v190_v41 = vmax.f32 %v186_v38, 0.0 }
 0x11d   :  { %v189_v42 = vmax.f32 %v181_v40, 0.0 }
 0x11f   :  { %v519_v43 = vpack.c.bf16 %v190_v41, %v189_v42 }
 0x121   :  { %520 = vmatpush3.bf16.msra.mxu1 %v519_v43 }
 0x122   :  { %465 = vmatprep.subr.mxu1 %v559_v32 }
 0x124   :  { %463 = vmatmul.mubr.msk.f32.vlgmr.msra.gmra.mrb[0].mxu1 %vm198_vm3, %v191_v44 }
 0x125   :  { %467 = vmatprep.mubr.msk.f32.mxu1 %vm558_vm2, %v559_v32 }
 0x1f7   :  { %v268_v46 = vpop.f32.mrb[0].mxu1 }
 0x1f8   :  { %v269_v47 = vadd.f32 %v268_v46, %v196_v45  ;;  %v464_v48 = vpop.f32.mrb[1].mxu1 }
 0x1fa   :  { %v272_v49 = vmax.f32 %v269_v47, 0.0 }
 0x1fc   :  { %466 = vmatpush3.msra.mxu1 %v272_v49 }
 0x1fd   :  { %468 = vmatmul.mubr.msk.f32.vlgmr.msra.gmra.mrb[2].mxu1 %vm284_vm4, %v273_v50 }
 0x2d0   :  { %v354_v56 = vpop.f32.mrb[2].mxu1 }
 0x2d1   :  { %v355_v57 = vadd.f32 %v354_v56, %v283_v55  ;;  %v469_v58 = vpop.f32.mrb[3].mxu1 }
 0x2d3   :  { %v399_v59 = vmul.f32 -1.442695, %v355_v57 }
 0x2d5   :  { %528 = vpow2.f32 %v399_v59 }
 0x2df   :  { %v529_v60 = vpop.eup %528 }
 0x2e0   :  { %v361_v61 = vadd.f32 1.0, %v529_v60 }
 0x2e2   :  { %530 = vrcp.f32 %v361_v61 }
 0x2ec   :  { %v531_v62 = vpop.eup %530 }
 0x2ed   :  { %364 = vst [vmem:[#allocation3] sm:$0x1] %v531_v62 }
 0x2ee   :  { %543 = shalt.err (!%p540_p4)
}
 0x2ef   :  { %s544_s2 = scalar_lea.hbm %s734_s7, 16 }
 0x2f0   :  { %p545_p5 = scmp.ne.s32.totalorder %s734_s7, %s544_s2  ;;  %p548_p6 = scmp.lt.u32.totalorder %s544_s2, %s734_s7 }
 0x2f2   :  { %p550_p7 = pnand %p548_p6, %p545_p5 }
 0x2f4   :  { %553 = shalt.err (!%p550_p7)
}
 0x2f5   :  { %374 = dma.vmem_to_hbm [thread:$0]  %s372_s20, 16, %s734_s7, [#allocation4]  }
 0x2f6   :  { %554 = dma.done.wait [#allocation4], 16  }
 0x2f7   :  { %555 = vsyncadd [#allocation4], 4294967280 }
 0x2f8   :  { %378 = vsyncpa [#allocation4], 1 }

</bundles_post_ra>
